<compile_context>
chip_gen: v6e
topology: v6e:2x2x1
jax: 0.10.0
libtpu: 0.0.40
codegen_flags: <defaults>
</compile_context>

<pallas_src>
import jax
import jax.numpy as jnp
from jax.experimental import pallas as pl
from jax.experimental.pallas import tpu as pltpu

N_CLUSTS = 8        # C
N_DIMS = 32         # D
BATCH = 16          # N
MAX_TILE_N = 4096   # rows per grid step cap (keeps multi-tile "parallel" grids at large N)


def _round_up(v, m):
    return (v + m - 1) // m * m


def _make_kernel(C):
    """Kernel: fused matmul -> second-smallest over b -> (>0) as int8."""
    pow2 = C >= 2 and (C & (C - 1)) == 0

    def kernel(x_ref, wt_ref, o_ref):
        # Fused MXU matmul; the bias matrix rides along as an extra K row of wt
        # (matched by the ones column appended to x), so h already includes it.
        h = jnp.dot(x_ref[...], wt_ref[...],
                    preferred_element_type=jnp.float32)          # (tN, C*C) f32
        if pow2:
            # log2(C)-level tree of (min1, min2) merges on full-width lanes.
            # Column r = b*C + a; every halving pairs columns sharing the same `a`
            # (the shift is always a multiple of C), so after the tree column a holds
            # the two smallest of h[n, :, a].
            width = C * C
            half = width // 2
            lo, hi = h[:, :half], h[:, half:width]
            min1 = jnp.minimum(lo, hi)
            min2 = jnp.maximum(lo, hi)
            width = half
            while width > C:
                half = width // 2
                m1a, m1b = min1[:, :half], min1[:, half:width]
                m2a, m2b = min2[:, :half], min2[:, half:width]
                new_min1 = jnp.minimum(m1a, m1b)
                new_min2 = jnp.minimum(jnp.maximum(m1a, m1b), jnp.minimum(m2a, m2b))
                min1, min2, width = new_min1, new_min2, half
        else:
            # Fallback running two-smallest for non-power-of-two C.
            tn = h.shape[0]
            inf = jnp.float32(jnp.inf)
            min1 = jnp.full((tn, C), inf, jnp.float32)
            min2 = jnp.full((tn, C), inf, jnp.float32)
            for b in range(C):
                h_b = h[:, b * C:(b + 1) * C]
                min2 = jnp.where(h_b < min1, min1, jnp.minimum(min2, h_b))
                min1 = jnp.minimum(min1, h_b)
        # min2[:, a] = second-smallest h[n, :, a]  (== torch (-(-h).topk(2,1)[0])[:,1,:])
        o_ref[...] = (min2 > 0).astype(jnp.int8)

    return kernel


def _prepare_operands(x, coords, use_bf16):
    """Fused operands: x augmented with a ones column, wt with the bias row appended."""
    C, D = coords.shape
    N = x.shape[0]
    # w_flat[b*C + a, :] = coords[b] - coords[a]
    w_flat = (coords[:, None, :] - coords[None, :, :]).reshape(C * C, D)
    sq = jnp.sum(coords * coords, axis=1)                     # == ||coords||^2 (sqnorm)
    bias_flat = (sq[:, None] - sq[None, :]).reshape(C * C)    # [b*C + a] = sq[b] - sq[a]
    k_pad = _round_up(D + 1, 8)
    wt = jnp.zeros((k_pad, C * C), jnp.float32)
    wt = wt.at[:D, :].set(w_flat.T)
    wt = wt.at[D, :].set(bias_flat)                           # bias folded in as K row D
    x_aug = jnp.zeros((N, k_pad), jnp.float32)
    x_aug = x_aug.at[:, :D].set(x.astype(jnp.float32))
    x_aug = x_aug.at[:, D].set(1.0)                           # ones column hits the bias row
    if use_bf16:
        return x_aug.astype(jnp.bfloat16), wt.astype(jnp.bfloat16)
    return x_aug, wt


def kmadness_forward(x, coords, *, use_bf16=True, max_tile_n=MAX_TILE_N):
    C, D = coords.shape
    assert C >= 2, "second-smallest needs at least two clusters"
    N = x.shape[0]

    x_in, wt = _prepare_operands(x, coords, use_bf16)
    k_pad = wt.shape[0]

    # Row tiling: one tile covers the whole batch at small N; large batches get a
    # multi-step "parallel" grid (<= max_tile_n rows per step) so both v7x TCs work.
    num_tiles = -(-N // max_tile_n)
    mult = 8 if num_tiles == 1 else 32        # 32 keeps bf16/int8 sublane tiling happy when tiled
    tile_n = _round_up(-(-N // num_tiles), mult)
    n_pad = num_tiles * tile_n
    if n_pad != N:
        x_in = jnp.pad(x_in, ((0, n_pad - N), (0, 0)))        # padded rows are sliced off below

    out_i8 = pl.pallas_call(
        _make_kernel(C),
        out_shape=jax.ShapeDtypeStruct((n_pad, C), jnp.int8),
        grid_spec=pltpu.PrefetchScalarGridSpec(
            num_scalar_prefetch=0,
            grid=(pl.cdiv(n_pad, tile_n),),
            in_specs=[
                pl.BlockSpec((tile_n, k_pad), lambda i: (i, 0)),
                pl.BlockSpec((k_pad, C * C), lambda i: (0, 0)),
            ],
            out_specs=pl.BlockSpec((tile_n, C), lambda i: (i, 0)),
        ),
        compiler_params=pltpu.CompilerParams(
            dimension_semantics=("parallel",)),
    )(x_in, wt)
    return out_i8[:N] != 0


def kmadness_reference_f32(x, coords):
    """Pure-JAX f32 transcription of the PyTorch forward. Returns (bool out, decision margin)."""
    w = coords[None, :, :] - coords[:, None, :]               # w[a, b, d] = coords[b] - coords[a]
    sq = jnp.sum(coords * coords, axis=1)
    bmat = sq[:, None] - sq[None, :]
    M = jnp.einsum('abd,nd->abn', w, x)                       # matmul(w, x.T)
    h = jnp.transpose(M, (2, 1, 0)) + bmat[None, :, :]        # h[n, b, a]
    second = jnp.sort(h, axis=1)[:, 1, :]                     # second-smallest over b
    return second > 0, second


def kmadness_reference_matched(x, coords, use_bf16=True):
    """Same semantics, computed from the *identical rounded operands* the kernel sees."""
    C = coords.shape[0]
    x_in, wt = _prepare_operands(x, coords, use_bf16)
    h = jnp.dot(x_in.astype(jnp.float32), wt.astype(jnp.float32),
                preferred_element_type=jnp.float32).reshape(x.shape[0], C, C)  # [n, b, a]
    return jnp.sort(h, axis=1)[:, 1, :] > 0


if __name__ == "__main__":
    key = jax.random.PRNGKey(0)
    k_coords, k_x = jax.random.split(key)
    # Deterministic "torch.rand"-like parameter init and synthetic input x.
    coords = jax.random.uniform(k_coords, (N_CLUSTS, N_DIMS), dtype=jnp.float32)
    x = jax.random.normal(k_x, (BATCH, N_DIMS), dtype=jnp.float32)

    out = kmadness_forward(x, coords)           # default path: bf16 operands, f32 accum/compare
    jax.block_until_ready(out)

    assert out.shape == (BATCH, N_CLUSTS)
    assert out.dtype == jnp.bool_

    # Exact check against a reference built from the identical bf16-rounded operands.
    ref_matched = kmadness_reference_matched(x, coords, use_bf16=True)
    assert bool(jnp.all(out == ref_matched))

    # Semantic check against the pure-f32 PyTorch transcription: any disagreement may only
    # occur where the f32 decision margin is tiny (bf16 operand rounding can flip those).
    ref_bool, margin = kmadness_reference_f32(x, coords)
    ok = (out == ref_bool) | (jnp.abs(margin) < 0.25)
    assert bool(jnp.all(ok))

    print("KERNEL_OK")
</pallas_src>

<mosaic_0001>
module attributes {stable_mosaic.version = 11 : i64} {
  func.func @kernel(%arg0: i32, %arg1: memref<16x40xbf16, #tpu.memory_space<vmem>>, %arg2: memref<40x64xbf16, #tpu.memory_space<vmem>>, %arg3: memref<16x8xi8, #tpu.memory_space<vmem>>) attributes {dimension_semantics = [#tpu.dimension_semantics<parallel>], iteration_bounds = array<i64: 1>, scalar_prefetch = 0 : i64, scratch_operands = 0 : i64, tpu.core_type = #tpu.core_type<tc>, window_params = [{transform_indices = @transform_0, window_bounds = array<i64: 16, 40>}, {pipeline_mode = #tpu.pipeline_mode<synchronous>, transform_indices = @transform_1, window_bounds = array<i64: 40, 64>}, {transform_indices = @transform_2, window_bounds = array<i64: 16, 8>}]} {
    %c0 = arith.constant 0 : index
    %c0_0 = arith.constant 0 : index
    %0 = vector.load %arg1[%c0, %c0_0] : memref<16x40xbf16, #tpu.memory_space<vmem>>, vector<16x40xbf16>
    %c0_1 = arith.constant 0 : index
    %c0_2 = arith.constant 0 : index
    %1 = vector.load %arg2[%c0_1, %c0_2] : memref<40x64xbf16, #tpu.memory_space<vmem>>, vector<40x64xbf16>
    %cst = arith.constant dense<0.000000e+00> : vector<16x64xf32>
    %2 = tpu.matmul %0, %1, %cst {dimension_numbers = #tpu.dot_dimension_numbers<[1], [0], [0], [1], [0, 0, 1, 1], [], []>} : vector<16x40xbf16>, vector<40x64xbf16>, vector<16x64xf32> -> vector<16x64xf32>
    %3 = vector.extract_strided_slice %2 {offsets = [0, 0], sizes = [16, 32], strides = [1, 1]} : vector<16x64xf32> to vector<16x32xf32>
    %4 = vector.extract_strided_slice %2 {offsets = [0, 32], sizes = [16, 32], strides = [1, 1]} : vector<16x64xf32> to vector<16x32xf32>
    %5 = arith.minimumf %3, %4 : vector<16x32xf32>
    %6 = arith.maximumf %3, %4 : vector<16x32xf32>
    %7 = vector.extract_strided_slice %5 {offsets = [0, 0], sizes = [16, 16], strides = [1, 1]} : vector<16x32xf32> to vector<16x16xf32>
    %8 = vector.extract_strided_slice %5 {offsets = [0, 16], sizes = [16, 16], strides = [1, 1]} : vector<16x32xf32> to vector<16x16xf32>
    %9 = vector.extract_strided_slice %6 {offsets = [0, 0], sizes = [16, 16], strides = [1, 1]} : vector<16x32xf32> to vector<16x16xf32>
    %10 = vector.extract_strided_slice %6 {offsets = [0, 16], sizes = [16, 16], strides = [1, 1]} : vector<16x32xf32> to vector<16x16xf32>
    %11 = arith.minimumf %7, %8 : vector<16x16xf32>
    %12 = arith.maximumf %7, %8 : vector<16x16xf32>
    %13 = arith.minimumf %9, %10 : vector<16x16xf32>
    %14 = arith.minimumf %12, %13 : vector<16x16xf32>
    %15 = vector.extract_strided_slice %11 {offsets = [0, 0], sizes = [16, 8], strides = [1, 1]} : vector<16x16xf32> to vector<16x8xf32>
    %16 = vector.extract_strided_slice %11 {offsets = [0, 8], sizes = [16, 8], strides = [1, 1]} : vector<16x16xf32> to vector<16x8xf32>
    %17 = vector.extract_strided_slice %14 {offsets = [0, 0], sizes = [16, 8], strides = [1, 1]} : vector<16x16xf32> to vector<16x8xf32>
    %18 = vector.extract_strided_slice %14 {offsets = [0, 8], sizes = [16, 8], strides = [1, 1]} : vector<16x16xf32> to vector<16x8xf32>
    %19 = arith.maximumf %15, %16 : vector<16x8xf32>
    %20 = arith.minimumf %17, %18 : vector<16x8xf32>
    %21 = arith.minimumf %19, %20 : vector<16x8xf32>
    %cst_3 = arith.constant 0.000000e+00 : f32
    %22 = vector.broadcast %cst_3 : f32 to vector<16x8xf32>
    %23 = arith.cmpf ogt, %21, %22 : vector<16x8xf32>
    %24 = arith.extui %23 : vector<16x8xi1> to vector<16x8xi8>
    %c0_4 = arith.constant 0 : index
    %c0_5 = arith.constant 0 : index
    %25 = vector.load %arg3[%c0_4, %c0_5] : memref<16x8xi8, #tpu.memory_space<vmem>>, vector<16x8xi8>
    tpu.vector_store %arg3[%c0_4, %c0_5], %24 {strides = array<i32>} : memref<16x8xi8, #tpu.memory_space<vmem>>, vector<16x8xi8>,
    return
  }
  func.func @transform_0(%arg0: i32) -> (i32, i32) {
    %c0_i32 = arith.constant 0 : i32
    %c0_i32_0 = arith.constant 0 : i32
    return %arg0, %c0_i32 : i32, i32
  }
  func.func @transform_1(%arg0: i32) -> (i32, i32) {
    %c0_i32 = arith.constant 0 : i32
    %c0_i32_0 = arith.constant 0 : i32
    %c0_i32_1 = arith.constant 0 : i32
    return %c0_i32, %c0_i32_0 : i32, i32
  }
  func.func @transform_2(%arg0: i32) -> (i32, i32) {
    %c0_i32 = arith.constant 0 : i32
    %c0_i32_0 = arith.constant 0 : i32
    return %arg0, %c0_i32 : i32, i32
  }
}

</mosaic_0001>

<bundles_post_ra>
// kernel: tpu_custom_call.1
= control target key start
LH: loop header
LB: loop body
LE: loop exit
PB: predicated region body
PF: predicated region fallthrough
CT: control target
= control target key end

     0   :  { %7 = vsyncpa [#allocation3], 0  ;;  %s310_s0 = inlined_call_operand.hbm [shape: bf16[16,40], index: 0, kind: input, shape index: {}]   ;;  %s311_s1 = inlined_call_operand.hbm [shape: bf16[40,64], index: 1, kind: input, shape index: {}]   ;;  %s312_s2 = inlined_call_operand.vmem [shape: s8[16,8], index: 2, kind: output, shape index: {}]  }
   0x1   :  { %8 = vsyncpa [#allocation5], 0  ;;  %s273_s9 = smov [#allocation2]  }
   0x2   :  { %s14_s10 = sshll.u32 %s273_s9, 4  ;;  %s15_s10 = int_to_ptr.vmem [resolvable:$true] %s14_s10 }
   0x3   :  { %s237_s11 = scalar_lea.vmem %s15_s10, 128  ;;  %p242_p1 = scmp.lt.s32.totalorder %s15_s10, %s15_s10 }
   0x4   :  { %p238_p0 = scmp.ne.s32.totalorder %s15_s10, %s237_s11  ;;  %p243_p2 = scmp.lt.s32.totalorder %s237_s11, %s237_s11 }
   0x6   :  { %p244_p3 = por %p243_p2, %p242_p1 }
   0x8   :  { %p245_p4 = pnand %p244_p3, %p238_p0 }
   0xa   :  { %248 = shalt.err (!%p245_p4)
}
   0xb   :  { %s274_s12 = smov 64   ;;  %s275_s13 = smov 4  }
   0xc   :  { %20 = dma.hbm_to_vmem [thread:$0]  %s310_s0, 128, %s15_s10, [#allocation3], %s274_s12, %s274_s12, %s275_s13  }
   0xd   :  { %s276_s16 = smov [#allocation4]  }
   0xe   :  { %s26_s17 = sshll.u32 %s276_s16, 4  ;;  %s27_s17 = int_to_ptr.vmem [resolvable:$true] %s26_s17 }
   0xf   :  { %s257_s18 = scalar_lea.vmem %s27_s17, 320  ;;  %p262_p6 = scmp.lt.s32.totalorder %s27_s17, %s27_s17 }
  0x10   :  { %p258_p5 = scmp.ne.s32.totalorder %s27_s17, %s257_s18  ;;  %p263_p7 = scmp.lt.s32.totalorder %s257_s18, %s257_s18 }
  0x12   :  { %p264_p8 = por %p263_p7, %p262_p6 }
  0x14   :  { %p265_p9 = pnand %p264_p8, %p258_p5 }
  0x16   :  { %268 = shalt.err (!%p265_p9)
}
  0x17   :  { %32 = dma.hbm_to_vmem [thread:$0]  %s311_s1, 320, %s27_s17, [#allocation5], %s274_s12, %s274_s12, %s275_s13  }
  0x18   :  { %269 = dma.done.wait [#allocation3], 128  }
  0x19   :  { %270 = vsyncadd [#allocation3], 4294967168 }
  0x1a   :  { %271 = dma.done.wait [#allocation5], 320  }
  0x1b   :  { %272 = vsyncadd [#allocation5], 4294966976  ;;  %v277_v0 = vmov 0.0   ;;  %vm278_vm0 = vmmov 0   ;;  %vm73_vm1 = vcmask 1043456   ;;  %v226_v3 = vld [vmem:[#allocation4 + $0x8] sm:$0xff]  }
  0x1c   :  { %205 = vmatprep.subr.bf16.mxu0 %v277_v0  ;;  %211 = vmatprep.mubr.msk.bf16.mxu0 %vm278_vm0, %v277_v0  ;;  %v225_v1 = vld [vmem:[#allocation4 + $0x10] ss:$0 sps:$4 sm:$0xff]   ;;  %v227_v4 = vld [vmem:[#allocation4] sm:$0xff]   ;;  %v228_v5 = vld [vmem:[#allocation2] sm:$0xff]   ;;  %vm69_vm2 = vcmask 326656   ;;  %s279_s0 = smov 96  }
  0x1d   :  { %v75_v2 = vsel %vm73_vm1, %v225_v1, 0  ;;  %s280_s1 = smov 112   ;;  %s281_s21 = smov 120   ;;  %v282_v38 = vmov 0   ;;  %vm187_vm7 = vcmask 58368  }
  0x1e   :  { %206 = vmatpush3.bf16.msra.mxu0 %v75_v2 }
  0x1f   :  { %207 = vmatprep.subr.bf16.mxu0 %v277_v0 }
  0x22   :  { %208 = vmatpush3.bf16.msra.mxu0 %v226_v3 }
  0x23   :  { %209 = vmatprep.subr.bf16.mxu0 %v277_v0 }
  0x26   :  { %210 = vmatpush3.bf16.msra.mxu0 %v227_v4 }
  0x29   :  { %212 = vmatmul.mubr.msk.bf16.vlgmr.msra.gmra.mxu0 %vm69_vm2, %v228_v5 }
  0xe9   :  { %v111_v6 = vpop.f32.mrf.mxu0 }
  0xea   :  { %120 = vrot.lane.b32.xlu0 %v111_v6, %s279_s0 }
  0xeb   :  { %v213_v7 = vpop.f32.mrf.mxu0 }
  0xed   :  { %v114_v8 = vpop.f32.mrf.mxu0 }
  0xee   :  { %122 = vrot.lane.b32.xlu0 %v114_v8, %s279_s0 }
  0xef   :  { %v214_v9 = vpop.f32.mrf.mxu0 }
 0x15c   :  { %v121_v10 = vpop.permute.xlu0 %120 }
 0x15d   :  { %v126_v11 = vmin.f32 %v111_v6, %v121_v10  ;;  %v128_v12 = vmax.f32 %v111_v6, %v121_v10 }
 0x15f   :  { %132 = vrot.lane.b32.xlu1 %v126_v11, %s280_s1  ;;  %144 = vrot.lane.b32.xlu0 %v128_v12, %s280_s1 }
 0x160   :  { %v123_v13 = vpop.permute.xlu0 %122 }
 0x161   :  { %v127_v14 = vmin.f32 %v114_v8, %v123_v13  ;;  %v129_v15 = vmax.f32 %v114_v8, %v123_v13 }
 0x163   :  { %134 = vrot.lane.b32.xlu1 %v127_v14, %s280_s1 }
 0x167   :  { %146 = vrot.lane.b32.xlu1 %v129_v15, %s280_s1 }
 0x1d1   :  { %v133_v16 = vpop.permute.xlu1 %132  ;;  %v145_v17 = vpop.permute.xlu0 %144 }
 0x1d2   :  { %v138_v18 = vmin.f32 %v126_v11, %v133_v16  ;;  %v140_v19 = vmax.f32 %v126_v11, %v133_v16  ;;  %v150_v20 = vmin.f32 %v128_v12, %v145_v17 }
 0x1d4   :  { %156 = vrot.lane.b32.xlu0 %v138_v18, %s281_s21  ;;  %v152_v22 = vmin.f32 %v140_v19, %v150_v20 }
 0x1d5   :  { %v135_v21 = vpop.permute.xlu1 %134 }
 0x1d6   :  { %v139_v23 = vmin.f32 %v127_v14, %v135_v21  ;;  %v141_v25 = vmax.f32 %v127_v14, %v135_v21 }
 0x1d8   :  { %158 = vrot.lane.b32.xlu1 %v139_v23, %s281_s21  ;;  %166 = vrot.lane.b32.xlu0 %v152_v22, %s281_s21 }
 0x1d9   :  { %v147_v24 = vpop.permute.xlu1 %146 }
 0x1da   :  { %v151_v26 = vmin.f32 %v129_v15, %v147_v24 }
 0x1dc   :  { %v153_v27 = vmin.f32 %v141_v25, %v151_v26 }
 0x1de   :  { %168 = vrot.lane.b32.xlu1 %v153_v27, %s281_s21 }
 0x246   :  { %v157_v28 = vpop.permute.xlu0 %156 }
 0x247   :  { %v162_v32 = vmax.f32 %v138_v18, %v157_v28 }
 0x24a   :  { %v167_v29 = vpop.permute.xlu0 %166  ;;  %v159_v30 = vpop.permute.xlu1 %158 }
 0x24b   :  { %v172_v31 = vmin.f32 %v152_v22, %v167_v29  ;;  %v163_v34 = vmax.f32 %v139_v23, %v159_v30 }
 0x24d   :  { %v174_v35 = vmin.f32 %v162_v32, %v172_v31 }
 0x24f   :  { %vm176_vm3 = vcmp.gt.f32.partialorder %v174_v35, 0.0 }
 0x250   :  { %v169_v33 = vpop.permute.xlu1 %168 }
 0x251   :  { %v173_v36 = vmin.f32 %v153_v27, %v169_v33 }
 0x253   :  { %v175_v37 = vmin.f32 %v163_v34, %v173_v36 }
 0x255   :  { %vm177_vm4 = vcmp.gt.f32.partialorder %v175_v37, 0.0 }
 0x256   :  { %vm178_vm5 = vmpackc.low %vm177_vm4, %vm176_vm3 }
 0x257   :  { %vm179_vm6 = vmpackc.even %vm178_vm5, %vm178_vm5 }
 0x258   :  { %v180_v39 = vsel %vm179_vm6, 16843009, %v282_v38 }
 0x259   :  { %v181_v40 = vunpack.c.0.s8 %v180_v39  ;;  %v182_v41 = vunpack.c.1.s8 %v180_v39 }
 0x25b   :  { %v183_v42 = vpack.c.b16 %v181_v40, %v181_v40  ;;  %v185_v43 = vpack.c.b16 %v182_v41, %v182_v41 }
 0x25d   :  { %v184_v44 = vpack.c.b8 %v183_v42, %v183_v42  ;;  %v186_v45 = vpack.c.b8 %v185_v43, %v185_v43 }
 0x25f   :  { %188 = vst.msk [vmem:[%s312_s2] sm:$0x3] %vm187_vm7, %v184_v44  ;;  %189 = vst.msk [vmem:[%s312_s2 + $0x2] sm:$0x3] %vm187_vm7, %v186_v45 }
 0x260   :  { %194 = vsyncpa [#allocation3], 1 }
 0x261   :  { %195 = vsyncpa [#allocation5], 1 }

</bundles_post_ra>
